<compile_context>
chip_gen: v6e
topology: v6e:2x2x1
jax: 0.10.0
libtpu: 0.0.40
codegen_flags: <defaults>
</compile_context>

<pallas_src>
import jax
import jax.numpy as jnp
from jax.experimental import pallas as pl

# --- model dimensions (small, consistent with the module's intent) ----------
B, T, F = 2, 8, 16          # batch, sequence length, seq features (first 9 = DLQ one-hot)
NDLQ = 9                    # number of DLQ states (one-hot width)
NDLQ_PAD = 16               # per-step output lane padding (TP * 16 = 128 lanes)
H = 32                      # encoder hidden size ("lstm_size")
A, YMD = 4, 3               # acquisition features, year/month/day features
TP, M = 8, 8                # macro prediction horizon, macro feature count
H2 = 32                     # decoder hidden size
W_LANES = 32                # weight-slab lane width (== H == H2)

assert H == W_LANES and H2 == W_LANES
assert F >= NDLQ_PAD        # encoder last-row vector feeds the padded dlq path directly

_NEG = -1e30                # padded-logit bias: exp underflows to exactly 0


# --- weight slab layout: 8-row (sublane) aligned static offsets --------------
def _align8(n):
    return -(-n // 8) * 8


_LAYOUT = {}
_off = 0
for _name, _rows in (("w_in", F), ("b_in", 1), ("w_auxin", YMD + A), ("b_aux", 1),
                     ("w_pool", H), ("w_aux", H), ("b_out", 1),
                     ("w_dout", H), ("w_ddlq", NDLQ_PAD), ("w_dmac", M), ("b_dh", 1),
                     ("w_cls", H2), ("b_cls", 1)):
    _LAYOUT[_name] = (_off, _rows)
    _off = _align8(_off + _rows)
W_ROWS = _off  # 216


def _full_spec(shape):
    """Whole-array block resident in VMEM (gridless call)."""
    n = len(shape)
    return pl.BlockSpec(shape, lambda: (0,) * n)


def _slab(w_ref, name):
    """Static, sublane-aligned slice of the packed weight slab."""
    off, rows = _LAYOUT[name]
    return w_ref[pl.ds(off, rows), :]


# ---------------------------------------------------------------------------
# Fused encoder + decoder kernel (single gridless invocation).
# ---------------------------------------------------------------------------
def ccarm4_kernel(seq_len_ref,          # [B, 1]     int32
                  seq_ref,              # [B*T, F]   f32
                  aux_ref,              # [B, YMD+A] f32
                  macro_ref,            # [TP*B, M]  f32  (step-major)
                  w_ref,                # [W_ROWS, 32] f32 packed slab
                  out_ref):             # [B, TP*NDLQ_PAD] f32
    f32 = jnp.float32

    # ---- loop-invariant weight slices (loaded once) ------------------------
    w_in = _slab(w_ref, "w_in")          # [F, H]
    b_in = _slab(w_ref, "b_in")          # [1, H]
    w_auxin = _slab(w_ref, "w_auxin")    # [YMD+A, H]
    b_aux = _slab(w_ref, "b_aux")        # [1, H]
    w_pool = _slab(w_ref, "w_pool")      # [H, H]
    w_aux = _slab(w_ref, "w_aux")        # [H, H]
    b_out = _slab(w_ref, "b_out")        # [1, H]
    w_dout = _slab(w_ref, "w_dout")      # [H, H2]
    w_ddlq = _slab(w_ref, "w_ddlq")      # [NDLQ_PAD, H2]  rows >= NDLQ are zero
    w_dmac = _slab(w_ref, "w_dmac")      # [M, H2]
    b_dh = _slab(w_ref, "b_dh")          # [1, H2]
    w_cls = _slab(w_ref, "w_cls")        # [H2, 32]  cols >= NDLQ are zero
    b_cls = _slab(w_ref, "b_cls")        # [1, 32]   cols >= NDLQ are -1e30

    # ------------------------------ encoder ---------------------------------
    seq = seq_ref[...]                                                   # [B*T, F]
    h = jnp.tanh(jnp.dot(seq, w_in, preferred_element_type=f32) + b_in)  # [B*T, H]

    # Vectorized length masks as [B, B*T] selection matrices (one iota compare,
    # no per-batch scalar loop); masked pooling / last-row pick become matmuls.
    sl = jnp.clip(seq_len_ref[...], 0, T)                                # [B, 1] int32
    row = jax.lax.broadcasted_iota(jnp.int32, (B, B * T), 0)
    col = jax.lax.broadcasted_iota(jnp.int32, (B, B * T), 1)
    in_block = (col >= row * T) & (col < row * T + T)
    valid_sel = (in_block & (col < row * T + sl)).astype(f32)            # [B, B*T]
    last_sel = (in_block & (col == row * T + sl - 1) & (sl > 0)).astype(f32)

    denom = jnp.maximum(sl.astype(f32), 1.0)                             # [B, 1]
    pooled = jnp.dot(valid_sel, h, preferred_element_type=f32) / denom   # [B, H]
    # last valid timestep's features; lanes >= NDLQ are ignored because the
    # corresponding w_ddlq rows are zero-padded.
    dlq = jnp.dot(last_sel, seq, preferred_element_type=f32)[:, :NDLQ_PAD]  # [B, 16]

    aux = jnp.tanh(jnp.dot(aux_ref[...], w_auxin, preferred_element_type=f32)
                   + b_aux)                                              # [B, H]
    enc = jnp.tanh(jnp.dot(pooled, w_pool, preferred_element_type=f32)
                   + jnp.dot(aux, w_aux, preferred_element_type=f32)
                   + b_out)                                              # [B, H]

    # ------------------------------ decoder ---------------------------------
    # Loop-invariant terms hoisted off the serial autoregressive path.
    base = jnp.dot(enc, w_dout, preferred_element_type=f32) + b_dh       # [B, H2]
    macro_proj = jnp.dot(macro_ref[...], w_dmac,
                         preferred_element_type=f32)                     # [TP*B, H2]

    chunks = []
    for t in range(TP):                       # TP is small -> static unroll
        z = jnp.tanh(base
                     + jnp.dot(dlq, w_ddlq, preferred_element_type=f32)
                     + macro_proj[t * B:(t + 1) * B, :])                 # [B, H2]
        # |z| <= 1 (tanh) and weights are small, so logits are bounded and the
        # softmax max-subtraction is safely dropped from the serial chain.
        logits = jnp.dot(z, w_cls, preferred_element_type=f32) + b_cls   # [B, 32]
        e = jnp.exp(logits)                   # padded lanes: exp(-1e30) == 0
        p = e / jnp.sum(e, axis=-1, keepdims=True)   # exact divide (no AR drift)
        dlq = p[:, :NDLQ_PAD]                 # autoregressive feedback, lanes 9..15 == 0
        chunks.append(dlq)                    # [B, 16]

    # single lane-dense bulk store: (B, TP*16) = (B, 128)
    out_ref[...] = jnp.concatenate(chunks, axis=-1)


# ---------------------------------------------------------------------------
# Host-side parameter packing (one DMA slab instead of 14 tiny inputs).
# ---------------------------------------------------------------------------
def pack_params(params):
    w_auxin = jnp.concatenate([params["w_ymd"], params["w_acq"]], axis=0)
    w_ddlq = jnp.zeros((NDLQ_PAD, H2), jnp.float32).at[:NDLQ, :].set(params["w_ddlq"])
    w_cls = jnp.zeros((H2, W_LANES), jnp.float32).at[:, :NDLQ].set(params["w_cls"])
    b_cls = jnp.full((1, W_LANES), _NEG, jnp.float32).at[:, :NDLQ].set(params["b_cls"])
    pieces = {
        "w_in": params["w_in"], "b_in": params["b_in"],
        "w_auxin": w_auxin, "b_aux": params["b_aux"],
        "w_pool": params["w_pool"], "w_aux": params["w_aux"], "b_out": params["b_out"],
        "w_dout": params["w_dout"], "w_ddlq": w_ddlq, "w_dmac": params["w_dmac"],
        "b_dh": params["b_dh"], "w_cls": w_cls, "b_cls": b_cls,
    }
    slab = jnp.zeros((W_ROWS, W_LANES), jnp.float32)
    for name, (off, rows) in _LAYOUT.items():
        p = pieces[name].astype(jnp.float32)
        assert p.shape[0] == rows and p.shape[1] <= W_LANES
        slab = slab.at[off:off + rows, :p.shape[1]].set(p)
    return slab


# ---------------------------------------------------------------------------
# Wrapper (free XLA layout plumbing + one pallas_call).
# ---------------------------------------------------------------------------
def ccarm4_forward(seq, seq_len, ymd, acq, macro_pred, w_slab):
    seq_flat = seq.reshape(B * T, F)
    aux_in = jnp.concatenate([ymd, acq], axis=-1)                         # [B, YMD+A]
    macro_flat = jnp.transpose(macro_pred, (1, 0, 2)).reshape(TP * B, M)  # step-major
    seq_len = seq_len.astype(jnp.int32).reshape(B, 1)

    args = (seq_len, seq_flat, aux_in, macro_flat, w_slab)

    cost = pl.CostEstimate(
        flops=2 * (B * T * F * H + B * (B * T) * (H + F) + B * (YMD + A) * H
                   + 2 * B * H * H + B * H * H2 + TP * B * M * H2
                   + TP * B * (NDLQ_PAD * H2 + H2 * W_LANES)),
        transcendentals=B * T * H + 2 * B * H + TP * B * (H2 + W_LANES),
        bytes_accessed=4 * (B * T * F + B * (YMD + A) + TP * B * M
                            + W_ROWS * W_LANES + B * TP * NDLQ_PAD + B),
    )

    out_flat = pl.pallas_call(
        ccarm4_kernel,
        out_shape=jax.ShapeDtypeStruct((B, TP * NDLQ_PAD), jnp.float32),
        in_specs=[_full_spec(a.shape) for a in args],
        out_specs=_full_spec((B, TP * NDLQ_PAD)),
        cost_estimate=cost,
    )(*args)

    # layout plumbing only (free XLA reshape + slice of the padded lanes)
    return out_flat.reshape(B, TP, NDLQ_PAD)[:, :, :NDLQ]


def init_params(key):
    ks = jax.random.split(key, 16)
    s = 0.1
    return {
        # encoder
        "w_in":   s * jax.random.normal(ks[0], (F, H), jnp.float32),
        "b_in":   jnp.zeros((1, H), jnp.float32),
        "w_ymd":  s * jax.random.normal(ks[1], (YMD, H), jnp.float32),
        "w_acq":  s * jax.random.normal(ks[2], (A, H), jnp.float32),
        "b_aux":  jnp.zeros((1, H), jnp.float32),
        "w_pool": s * jax.random.normal(ks[3], (H, H), jnp.float32),
        "w_aux":  s * jax.random.normal(ks[4], (H, H), jnp.float32),
        "b_out":  jnp.zeros((1, H), jnp.float32),
        # decoder
        "w_dout": s * jax.random.normal(ks[5], (H, H2), jnp.float32),
        "w_ddlq": s * jax.random.normal(ks[6], (NDLQ, H2), jnp.float32),
        "w_dmac": s * jax.random.normal(ks[7], (M, H2), jnp.float32),
        "b_dh":   jnp.zeros((1, H2), jnp.float32),
        "w_cls":  s * jax.random.normal(ks[8], (H2, NDLQ), jnp.float32),
        "b_cls":  jnp.zeros((1, NDLQ), jnp.float32),
    }


if __name__ == "__main__":
    key = jax.random.PRNGKey(0)
    kp, k1, k2, k3, k4, k5, k6 = jax.random.split(key, 7)

    params = init_params(kp)

    # build seq: first 9 features = one-hot DLQ state, rest continuous
    dlq_states = jax.random.randint(k1, (B, T), 0, NDLQ)
    dlq_onehot = jax.nn.one_hot(dlq_states, NDLQ, dtype=jnp.float32)
    cont = jax.random.normal(k2, (B, T, F - NDLQ), jnp.float32)
    seq = jnp.concatenate([dlq_onehot, cont], axis=-1)

    seq_len = jax.random.randint(k3, (B, 1), 3, T + 1).astype(jnp.int32)
    ymd = jax.random.normal(k4, (B, YMD), jnp.float32)
    acq = jax.random.normal(k5, (B, A), jnp.float32)
    macro_pred = jax.random.normal(k6, (B, TP, M), jnp.float32)

    # pack the 14 parameter arrays once, host-side, into one DMA-able slab
    w_slab = pack_params(params)

    fwd = jax.jit(lambda s, sl, y, a, m: ccarm4_forward(s, sl, y, a, m, w_slab))
    dlq_seq = jax.block_until_ready(fwd(seq, seq_len, ymd, acq, macro_pred))

    assert dlq_seq.shape == (B, TP, NDLQ)
    assert bool(jnp.all(jnp.isfinite(dlq_seq)))
    assert bool(jnp.all(dlq_seq >= 0.0))
    # each forecast step is an exact probability distribution over DLQ states
    assert bool(jnp.allclose(jnp.sum(dlq_seq, axis=-1), 1.0, atol=1e-5))
    print("KERNEL_OK")
</pallas_src>

<mosaic_0001>
module attributes {stable_mosaic.version = 11 : i64} {
  func.func @ccarm4_kernel(%arg0: memref<2x1xi32, #tpu.memory_space<vmem>>, %arg1: memref<16x16xf32, #tpu.memory_space<vmem>>, %arg2: memref<2x7xf32, #tpu.memory_space<vmem>>, %arg3: memref<16x8xf32, #tpu.memory_space<vmem>>, %arg4: memref<216x32xf32, #tpu.memory_space<vmem>>, %arg5: memref<2x128xf32, #tpu.memory_space<vmem>>) attributes {dimension_semantics = [], scalar_prefetch = 0 : i64, scratch_operands = 0 : i64, tpu.core_type = #tpu.core_type<tc>} {
    %c0 = arith.constant 0 : index
    %c0_0 = arith.constant 0 : index
    %0 = vector.load %arg4[%c0, %c0_0] : memref<216x32xf32, #tpu.memory_space<vmem>>, vector<16x32xf32>
    %c16 = arith.constant 16 : index
    %c0_1 = arith.constant 0 : index
    %1 = vector.load %arg4[%c16, %c0_1] : memref<216x32xf32, #tpu.memory_space<vmem>>, vector<1x32xf32>
    %c24 = arith.constant 24 : index
    %c0_2 = arith.constant 0 : index
    %2 = vector.load %arg4[%c24, %c0_2] : memref<216x32xf32, #tpu.memory_space<vmem>>, vector<7x32xf32>
    %c32 = arith.constant 32 : index
    %c0_3 = arith.constant 0 : index
    %3 = vector.load %arg4[%c32, %c0_3] : memref<216x32xf32, #tpu.memory_space<vmem>>, vector<1x32xf32>
    %c40 = arith.constant 40 : index
    %c0_4 = arith.constant 0 : index
    %4 = vector.load %arg4[%c40, %c0_4] : memref<216x32xf32, #tpu.memory_space<vmem>>, vector<32x32xf32>
    %c72 = arith.constant 72 : index
    %c0_5 = arith.constant 0 : index
    %5 = vector.load %arg4[%c72, %c0_5] : memref<216x32xf32, #tpu.memory_space<vmem>>, vector<32x32xf32>
    %c104 = arith.constant 104 : index
    %c0_6 = arith.constant 0 : index
    %6 = vector.load %arg4[%c104, %c0_6] : memref<216x32xf32, #tpu.memory_space<vmem>>, vector<1x32xf32>
    %c112 = arith.constant 112 : index
    %c0_7 = arith.constant 0 : index
    %7 = vector.load %arg4[%c112, %c0_7] : memref<216x32xf32, #tpu.memory_space<vmem>>, vector<32x32xf32>
    %c144 = arith.constant 144 : index
    %c0_8 = arith.constant 0 : index
    %8 = vector.load %arg4[%c144, %c0_8] : memref<216x32xf32, #tpu.memory_space<vmem>>, vector<16x32xf32>
    %c160 = arith.constant 160 : index
    %c0_9 = arith.constant 0 : index
    %9 = vector.load %arg4[%c160, %c0_9] : memref<216x32xf32, #tpu.memory_space<vmem>>, vector<8x32xf32>
    %c168 = arith.constant 168 : index
    %c0_10 = arith.constant 0 : index
    %10 = vector.load %arg4[%c168, %c0_10] : memref<216x32xf32, #tpu.memory_space<vmem>>, vector<1x32xf32>
    %c176 = arith.constant 176 : index
    %c0_11 = arith.constant 0 : index
    %11 = vector.load %arg4[%c176, %c0_11] : memref<216x32xf32, #tpu.memory_space<vmem>>, vector<32x32xf32>
    %c208 = arith.constant 208 : index
    %c0_12 = arith.constant 0 : index
    %12 = vector.load %arg4[%c208, %c0_12] : memref<216x32xf32, #tpu.memory_space<vmem>>, vector<1x32xf32>
    %c0_13 = arith.constant 0 : index
    %c0_14 = arith.constant 0 : index
    %13 = vector.load %arg1[%c0_13, %c0_14] : memref<16x16xf32, #tpu.memory_space<vmem>>, vector<16x16xf32>
    %cst = arith.constant dense<0.000000e+00> : vector<16x32xf32>
    %14 = tpu.matmul %13, %0, %cst {dimension_numbers = #tpu.dot_dimension_numbers<[1], [0], [0], [1], [0, 0, 1, 1], [], []>} : vector<16x16xf32>, vector<16x32xf32>, vector<16x32xf32> -> vector<16x32xf32>
    %15 = vector.broadcast %1 : vector<1x32xf32> to vector<16x32xf32>
    %16 = arith.addf %14, %15 : vector<16x32xf32>
    %17 = math.tanh %16 : vector<16x32xf32>
    %c0_15 = arith.constant 0 : index
    %c0_16 = arith.constant 0 : index
    %18 = vector.load %arg0[%c0_15, %c0_16] : memref<2x1xi32, #tpu.memory_space<vmem>>, vector<2x1xi32>
    %c0_i32 = arith.constant 0 : i32
    %c8_i32 = arith.constant 8 : i32
    %19 = vector.broadcast %c0_i32 : i32 to vector<2x1xi32>
    %20 = arith.maxsi %19, %18 : vector<2x1xi32>
    %21 = vector.broadcast %c8_i32 : i32 to vector<2x1xi32>
    %22 = arith.minsi %21, %20 : vector<2x1xi32>
    %23 = tpu.iota {dimensions = array<i32: 0>} : vector<2x16xi32>
    %24 = tpu.iota {dimensions = array<i32: 1>} : vector<2x16xi32>
    %c8_i32_17 = arith.constant 8 : i32
    %25 = vector.broadcast %c8_i32_17 : i32 to vector<2x16xi32>
    %26 = arith.muli %23, %25 : vector<2x16xi32>
    %27 = arith.cmpi sge, %24, %26 : vector<2x16xi32>
    %c8_i32_18 = arith.constant 8 : i32
    %28 = vector.broadcast %c8_i32_18 : i32 to vector<2x16xi32>
    %29 = arith.muli %23, %28 : vector<2x16xi32>
    %c8_i32_19 = arith.constant 8 : i32
    %30 = vector.broadcast %c8_i32_19 : i32 to vector<2x16xi32>
    %31 = arith.addi %29, %30 : vector<2x16xi32>
    %32 = arith.cmpi slt, %24, %31 : vector<2x16xi32>
    %33 = arith.andi %27, %32 : vector<2x16xi1>
    %c8_i32_20 = arith.constant 8 : i32
    %34 = vector.broadcast %c8_i32_20 : i32 to vector<2x16xi32>
    %35 = arith.muli %23, %34 : vector<2x16xi32>
    %36 = vector.broadcast %22 : vector<2x1xi32> to vector<2x16xi32>
    %37 = arith.addi %35, %36 : vector<2x16xi32>
    %38 = arith.cmpi slt, %24, %37 : vector<2x16xi32>
    %39 = arith.andi %33, %38 : vector<2x16xi1>
    %40 = arith.extui %39 : vector<2x16xi1> to vector<2x16xi32>
    %41 = arith.sitofp %40 : vector<2x16xi32> to vector<2x16xf32>
    %c8_i32_21 = arith.constant 8 : i32
    %42 = vector.broadcast %c8_i32_21 : i32 to vector<2x16xi32>
    %43 = arith.muli %23, %42 : vector<2x16xi32>
    %44 = vector.broadcast %22 : vector<2x1xi32> to vector<2x16xi32>
    %45 = arith.addi %43, %44 : vector<2x16xi32>
    %c1_i32 = arith.constant 1 : i32
    %46 = vector.broadcast %c1_i32 : i32 to vector<2x16xi32>
    %47 = arith.subi %45, %46 : vector<2x16xi32>
    %48 = arith.cmpi eq, %24, %47 : vector<2x16xi32>
    %49 = arith.andi %33, %48 : vector<2x16xi1>
    %c0_i32_22 = arith.constant 0 : i32
    %50 = vector.broadcast %c0_i32_22 : i32 to vector<2x1xi32>
    %51 = arith.cmpi sgt, %22, %50 : vector<2x1xi32>
    %52 = vector.broadcast %51 : vector<2x1xi1> to vector<2x16xi1>
    %53 = arith.andi %49, %52 : vector<2x16xi1>
    %54 = arith.extui %53 : vector<2x16xi1> to vector<2x16xi32>
    %55 = arith.sitofp %54 : vector<2x16xi32> to vector<2x16xf32>
    %56 = arith.sitofp %22 : vector<2x1xi32> to vector<2x1xf32>
    %cst_23 = arith.constant 1.000000e+00 : f32
    %57 = vector.broadcast %cst_23 : f32 to vector<2x1xf32>
    %58 = arith.maximumf %56, %57 : vector<2x1xf32>
    %cst_24 = arith.constant dense<0.000000e+00> : vector<2x32xf32>
    %59 = tpu.matmul %41, %17, %cst_24 {dimension_numbers = #tpu.dot_dimension_numbers<[1], [0], [0], [1], [0, 0, 1, 1], [], []>} : vector<2x16xf32>, vector<16x32xf32>, vector<2x32xf32> -> vector<2x32xf32>
    %60 = vector.broadcast %58 : vector<2x1xf32> to vector<2x32xf32>
    %61 = arith.divf %59, %60 : vector<2x32xf32>
    %cst_25 = arith.constant dense<0.000000e+00> : vector<2x16xf32>
    %62 = tpu.matmul %55, %13, %cst_25 {dimension_numbers = #tpu.dot_dimension_numbers<[1], [0], [0], [1], [0, 0, 1, 1], [], []>} : vector<2x16xf32>, vector<16x16xf32>, vector<2x16xf32> -> vector<2x16xf32>
    %c0_26 = arith.constant 0 : index
    %c0_27 = arith.constant 0 : index
    %63 = vector.load %arg2[%c0_26, %c0_27] : memref<2x7xf32, #tpu.memory_space<vmem>>, vector<2x7xf32>
    %cst_28 = arith.constant dense<0.000000e+00> : vector<2x32xf32>
    %64 = tpu.matmul %63, %2, %cst_28 {dimension_numbers = #tpu.dot_dimension_numbers<[1], [0], [0], [1], [0, 0, 1, 1], [], []>} : vector<2x7xf32>, vector<7x32xf32>, vector<2x32xf32> -> vector<2x32xf32>
    %65 = vector.broadcast %3 : vector<1x32xf32> to vector<2x32xf32>
    %66 = arith.addf %64, %65 : vector<2x32xf32>
    %67 = math.tanh %66 : vector<2x32xf32>
    %cst_29 = arith.constant dense<0.000000e+00> : vector<2x32xf32>
    %68 = tpu.matmul %61, %4, %cst_29 {dimension_numbers = #tpu.dot_dimension_numbers<[1], [0], [0], [1], [0, 0, 1, 1], [], []>} : vector<2x32xf32>, vector<32x32xf32>, vector<2x32xf32> -> vector<2x32xf32>
    %cst_30 = arith.constant dense<0.000000e+00> : vector<2x32xf32>
    %69 = tpu.matmul %67, %5, %cst_30 {dimension_numbers = #tpu.dot_dimension_numbers<[1], [0], [0], [1], [0, 0, 1, 1], [], []>} : vector<2x32xf32>, vector<32x32xf32>, vector<2x32xf32> -> vector<2x32xf32>
    %70 = arith.addf %68, %69 : vector<2x32xf32>
    %71 = vector.broadcast %6 : vector<1x32xf32> to vector<2x32xf32>
    %72 = arith.addf %70, %71 : vector<2x32xf32>
    %73 = math.tanh %72 : vector<2x32xf32>
    %cst_31 = arith.constant dense<0.000000e+00> : vector<2x32xf32>
    %74 = tpu.matmul %73, %7, %cst_31 {dimension_numbers = #tpu.dot_dimension_numbers<[1], [0], [0], [1], [0, 0, 1, 1], [], []>} : vector<2x32xf32>, vector<32x32xf32>, vector<2x32xf32> -> vector<2x32xf32>
    %75 = vector.broadcast %10 : vector<1x32xf32> to vector<2x32xf32>
    %76 = arith.addf %74, %75 : vector<2x32xf32>
    %c0_32 = arith.constant 0 : index
    %c0_33 = arith.constant 0 : index
    %77 = vector.load %arg3[%c0_32, %c0_33] : memref<16x8xf32, #tpu.memory_space<vmem>>, vector<16x8xf32>
    %cst_34 = arith.constant dense<0.000000e+00> : vector<16x32xf32>
    %78 = tpu.matmul %77, %9, %cst_34 {dimension_numbers = #tpu.dot_dimension_numbers<[1], [0], [0], [1], [0, 0, 1, 1], [], []>} : vector<16x8xf32>, vector<8x32xf32>, vector<16x32xf32> -> vector<16x32xf32>
    %cst_35 = arith.constant dense<0.000000e+00> : vector<2x32xf32>
    %79 = tpu.matmul %62, %8, %cst_35 {dimension_numbers = #tpu.dot_dimension_numbers<[1], [0], [0], [1], [0, 0, 1, 1], [], []>} : vector<2x16xf32>, vector<16x32xf32>, vector<2x32xf32> -> vector<2x32xf32>
    %80 = arith.addf %76, %79 : vector<2x32xf32>
    %81 = vector.extract_strided_slice %78 {offsets = [0, 0], sizes = [2, 32], strides = [1, 1]} : vector<16x32xf32> to vector<2x32xf32>
    %82 = arith.addf %80, %81 : vector<2x32xf32>
    %83 = math.tanh %82 : vector<2x32xf32>
    %cst_36 = arith.constant dense<0.000000e+00> : vector<2x32xf32>
    %84 = tpu.matmul %83, %11, %cst_36 {dimension_numbers = #tpu.dot_dimension_numbers<[1], [0], [0], [1], [0, 0, 1, 1], [], []>} : vector<2x32xf32>, vector<32x32xf32>, vector<2x32xf32> -> vector<2x32xf32>
    %85 = vector.broadcast %12 : vector<1x32xf32> to vector<2x32xf32>
    %86 = arith.addf %84, %85 : vector<2x32xf32>
    %87 = math.exp %86 : vector<2x32xf32>
    %cst_37 = arith.constant dense<0.000000e+00> : vector<2xf32>
    %88 = vector.multi_reduction <add>, %87, %cst_37 [1] : vector<2x32xf32> to vector<2xf32>
    %89 = vector.shape_cast %88 : vector<2xf32> to vector<2x1xf32>
    %90 = vector.broadcast %89 : vector<2x1xf32> to vector<2x32xf32>
    %91 = arith.divf %87, %90 : vector<2x32xf32>
    %92 = vector.extract_strided_slice %91 {offsets = [0, 0], sizes = [2, 16], strides = [1, 1]} : vector<2x32xf32> to vector<2x16xf32>
    %cst_38 = arith.constant dense<0.000000e+00> : vector<2x32xf32>
    %93 = tpu.matmul %92, %8, %cst_38 {dimension_numbers = #tpu.dot_dimension_numbers<[1], [0], [0], [1], [0, 0, 1, 1], [], []>} : vector<2x16xf32>, vector<16x32xf32>, vector<2x32xf32> -> vector<2x32xf32>
    %94 = arith.addf %76, %93 : vector<2x32xf32>
    %95 = vector.extract_strided_slice %78 {offsets = [2, 0], sizes = [2, 32], strides = [1, 1]} : vector<16x32xf32> to vector<2x32xf32>
    %96 = arith.addf %94, %95 : vector<2x32xf32>
    %97 = math.tanh %96 : vector<2x32xf32>
    %cst_39 = arith.constant dense<0.000000e+00> : vector<2x32xf32>
    %98 = tpu.matmul %97, %11, %cst_39 {dimension_numbers = #tpu.dot_dimension_numbers<[1], [0], [0], [1], [0, 0, 1, 1], [], []>} : vector<2x32xf32>, vector<32x32xf32>, vector<2x32xf32> -> vector<2x32xf32>
    %99 = vector.broadcast %12 : vector<1x32xf32> to vector<2x32xf32>
    %100 = arith.addf %98, %99 : vector<2x32xf32>
    %101 = math.exp %100 : vector<2x32xf32>
    %cst_40 = arith.constant dense<0.000000e+00> : vector<2xf32>
    %102 = vector.multi_reduction <add>, %101, %cst_40 [1] : vector<2x32xf32> to vector<2xf32>
    %103 = vector.shape_cast %102 : vector<2xf32> to vector<2x1xf32>
    %104 = vector.broadcast %103 : vector<2x1xf32> to vector<2x32xf32>
    %105 = arith.divf %101, %104 : vector<2x32xf32>
    %106 = vector.extract_strided_slice %105 {offsets = [0, 0], sizes = [2, 16], strides = [1, 1]} : vector<2x32xf32> to vector<2x16xf32>
    %cst_41 = arith.constant dense<0.000000e+00> : vector<2x32xf32>
    %107 = tpu.matmul %106, %8, %cst_41 {dimension_numbers = #tpu.dot_dimension_numbers<[1], [0], [0], [1], [0, 0, 1, 1], [], []>} : vector<2x16xf32>, vector<16x32xf32>, vector<2x32xf32> -> vector<2x32xf32>
    %108 = arith.addf %76, %107 : vector<2x32xf32>
    %109 = vector.extract_strided_slice %78 {offsets = [4, 0], sizes = [2, 32], strides = [1, 1]} : vector<16x32xf32> to vector<2x32xf32>
    %110 = arith.addf %108, %109 : vector<2x32xf32>
    %111 = math.tanh %110 : vector<2x32xf32>
    %cst_42 = arith.constant dense<0.000000e+00> : vector<2x32xf32>
    %112 = tpu.matmul %111, %11, %cst_42 {dimension_numbers = #tpu.dot_dimension_numbers<[1], [0], [0], [1], [0, 0, 1, 1], [], []>} : vector<2x32xf32>, vector<32x32xf32>, vector<2x32xf32> -> vector<2x32xf32>
    %113 = vector.broadcast %12 : vector<1x32xf32> to vector<2x32xf32>
    %114 = arith.addf %112, %113 : vector<2x32xf32>
    %115 = math.exp %114 : vector<2x32xf32>
    %cst_43 = arith.constant dense<0.000000e+00> : vector<2xf32>
    %116 = vector.multi_reduction <add>, %115, %cst_43 [1] : vector<2x32xf32> to vector<2xf32>
    %117 = vector.shape_cast %116 : vector<2xf32> to vector<2x1xf32>
    %118 = vector.broadcast %117 : vector<2x1xf32> to vector<2x32xf32>
    %119 = arith.divf %115, %118 : vector<2x32xf32>
    %120 = vector.extract_strided_slice %119 {offsets = [0, 0], sizes = [2, 16], strides = [1, 1]} : vector<2x32xf32> to vector<2x16xf32>
    %cst_44 = arith.constant dense<0.000000e+00> : vector<2x32xf32>
    %121 = tpu.matmul %120, %8, %cst_44 {dimension_numbers = #tpu.dot_dimension_numbers<[1], [0], [0], [1], [0, 0, 1, 1], [], []>} : vector<2x16xf32>, vector<16x32xf32>, vector<2x32xf32> -> vector<2x32xf32>
    %122 = arith.addf %76, %121 : vector<2x32xf32>
    %123 = vector.extract_strided_slice %78 {offsets = [6, 0], sizes = [2, 32], strides = [1, 1]} : vector<16x32xf32> to vector<2x32xf32>
    %124 = arith.addf %122, %123 : vector<2x32xf32>
    %125 = math.tanh %124 : vector<2x32xf32>
    %cst_45 = arith.constant dense<0.000000e+00> : vector<2x32xf32>
    %126 = tpu.matmul %125, %11, %cst_45 {dimension_numbers = #tpu.dot_dimension_numbers<[1], [0], [0], [1], [0, 0, 1, 1], [], []>} : vector<2x32xf32>, vector<32x32xf32>, vector<2x32xf32> -> vector<2x32xf32>
    %127 = vector.broadcast %12 : vector<1x32xf32> to vector<2x32xf32>
    %128 = arith.addf %126, %127 : vector<2x32xf32>
    %129 = math.exp %128 : vector<2x32xf32>
    %cst_46 = arith.constant dense<0.000000e+00> : vector<2xf32>
    %130 = vector.multi_reduction <add>, %129, %cst_46 [1] : vector<2x32xf32> to vector<2xf32>
    %131 = vector.shape_cast %130 : vector<2xf32> to vector<2x1xf32>
    %132 = vector.broadcast %131 : vector<2x1xf32> to vector<2x32xf32>
    %133 = arith.divf %129, %132 : vector<2x32xf32>
    %134 = vector.extract_strided_slice %133 {offsets = [0, 0], sizes = [2, 16], strides = [1, 1]} : vector<2x32xf32> to vector<2x16xf32>
    %cst_47 = arith.constant dense<0.000000e+00> : vector<2x32xf32>
    %135 = tpu.matmul %134, %8, %cst_47 {dimension_numbers = #tpu.dot_dimension_numbers<[1], [0], [0], [1], [0, 0, 1, 1], [], []>} : vector<2x16xf32>, vector<16x32xf32>, vector<2x32xf32> -> vector<2x32xf32>
    %136 = arith.addf %76, %135 : vector<2x32xf32>
    %137 = vector.extract_strided_slice %78 {offsets = [8, 0], sizes = [2, 32], strides = [1, 1]} : vector<16x32xf32> to vector<2x32xf32>
    %138 = arith.addf %136, %137 : vector<2x32xf32>
    %139 = math.tanh %138 : vector<2x32xf32>
    %cst_48 = arith.constant dense<0.000000e+00> : vector<2x32xf32>
    %140 = tpu.matmul %139, %11, %cst_48 {dimension_numbers = #tpu.dot_dimension_numbers<[1], [0], [0], [1], [0, 0, 1, 1], [], []>} : vector<2x32xf32>, vector<32x32xf32>, vector<2x32xf32> -> vector<2x32xf32>
    %141 = vector.broadcast %12 : vector<1x32xf32> to vector<2x32xf32>
    %142 = arith.addf %140, %141 : vector<2x32xf32>
    %143 = math.exp %142 : vector<2x32xf32>
    %cst_49 = arith.constant dense<0.000000e+00> : vector<2xf32>
    %144 = vector.multi_reduction <add>, %143, %cst_49 [1] : vector<2x32xf32> to vector<2xf32>
    %145 = vector.shape_cast %144 : vector<2xf32> to vector<2x1xf32>
    %146 = vector.broadcast %145 : vector<2x1xf32> to vector<2x32xf32>
    %147 = arith.divf %143, %146 : vector<2x32xf32>
    %148 = vector.extract_strided_slice %147 {offsets = [0, 0], sizes = [2, 16], strides = [1, 1]} : vector<2x32xf32> to vector<2x16xf32>
    %cst_50 = arith.constant dense<0.000000e+00> : vector<2x32xf32>
    %149 = tpu.matmul %148, %8, %cst_50 {dimension_numbers = #tpu.dot_dimension_numbers<[1], [0], [0], [1], [0, 0, 1, 1], [], []>} : vector<2x16xf32>, vector<16x32xf32>, vector<2x32xf32> -> vector<2x32xf32>
    %150 = arith.addf %76, %149 : vector<2x32xf32>
    %151 = vector.extract_strided_slice %78 {offsets = [10, 0], sizes = [2, 32], strides = [1, 1]} : vector<16x32xf32> to vector<2x32xf32>
    %152 = arith.addf %150, %151 : vector<2x32xf32>
    %153 = math.tanh %152 : vector<2x32xf32>
    %cst_51 = arith.constant dense<0.000000e+00> : vector<2x32xf32>
    %154 = tpu.matmul %153, %11, %cst_51 {dimension_numbers = #tpu.dot_dimension_numbers<[1], [0], [0], [1], [0, 0, 1, 1], [], []>} : vector<2x32xf32>, vector<32x32xf32>, vector<2x32xf32> -> vector<2x32xf32>
    %155 = vector.broadcast %12 : vector<1x32xf32> to vector<2x32xf32>
    %156 = arith.addf %154, %155 : vector<2x32xf32>
    %157 = math.exp %156 : vector<2x32xf32>
    %cst_52 = arith.constant dense<0.000000e+00> : vector<2xf32>
    %158 = vector.multi_reduction <add>, %157, %cst_52 [1] : vector<2x32xf32> to vector<2xf32>
    %159 = vector.shape_cast %158 : vector<2xf32> to vector<2x1xf32>
    %160 = vector.broadcast %159 : vector<2x1xf32> to vector<2x32xf32>
    %161 = arith.divf %157, %160 : vector<2x32xf32>
    %162 = vector.extract_strided_slice %161 {offsets = [0, 0], sizes = [2, 16], strides = [1, 1]} : vector<2x32xf32> to vector<2x16xf32>
    %cst_53 = arith.constant dense<0.000000e+00> : vector<2x32xf32>
    %163 = tpu.matmul %162, %8, %cst_53 {dimension_numbers = #tpu.dot_dimension_numbers<[1], [0], [0], [1], [0, 0, 1, 1], [], []>} : vector<2x16xf32>, vector<16x32xf32>, vector<2x32xf32> -> vector<2x32xf32>
    %164 = arith.addf %76, %163 : vector<2x32xf32>
    %165 = vector.extract_strided_slice %78 {offsets = [12, 0], sizes = [2, 32], strides = [1, 1]} : vector<16x32xf32> to vector<2x32xf32>
    %166 = arith.addf %164, %165 : vector<2x32xf32>
    %167 = math.tanh %166 : vector<2x32xf32>
    %cst_54 = arith.constant dense<0.000000e+00> : vector<2x32xf32>
    %168 = tpu.matmul %167, %11, %cst_54 {dimension_numbers = #tpu.dot_dimension_numbers<[1], [0], [0], [1], [0, 0, 1, 1], [], []>} : vector<2x32xf32>, vector<32x32xf32>, vector<2x32xf32> -> vector<2x32xf32>
    %169 = vector.broadcast %12 : vector<1x32xf32> to vector<2x32xf32>
    %170 = arith.addf %168, %169 : vector<2x32xf32>
    %171 = math.exp %170 : vector<2x32xf32>
    %cst_55 = arith.constant dense<0.000000e+00> : vector<2xf32>
    %172 = vector.multi_reduction <add>, %171, %cst_55 [1] : vector<2x32xf32> to vector<2xf32>
    %173 = vector.shape_cast %172 : vector<2xf32> to vector<2x1xf32>
    %174 = vector.broadcast %173 : vector<2x1xf32> to vector<2x32xf32>
    %175 = arith.divf %171, %174 : vector<2x32xf32>
    %176 = vector.extract_strided_slice %175 {offsets = [0, 0], sizes = [2, 16], strides = [1, 1]} : vector<2x32xf32> to vector<2x16xf32>
    %cst_56 = arith.constant dense<0.000000e+00> : vector<2x32xf32>
    %177 = tpu.matmul %176, %8, %cst_56 {dimension_numbers = #tpu.dot_dimension_numbers<[1], [0], [0], [1], [0, 0, 1, 1], [], []>} : vector<2x16xf32>, vector<16x32xf32>, vector<2x32xf32> -> vector<2x32xf32>
    %178 = arith.addf %76, %177 : vector<2x32xf32>
    %179 = vector.extract_strided_slice %78 {offsets = [14, 0], sizes = [2, 32], strides = [1, 1]} : vector<16x32xf32> to vector<2x32xf32>
    %180 = arith.addf %178, %179 : vector<2x32xf32>
    %181 = math.tanh %180 : vector<2x32xf32>
    %cst_57 = arith.constant dense<0.000000e+00> : vector<2x32xf32>
    %182 = tpu.matmul %181, %11, %cst_57 {dimension_numbers = #tpu.dot_dimension_numbers<[1], [0], [0], [1], [0, 0, 1, 1], [], []>} : vector<2x32xf32>, vector<32x32xf32>, vector<2x32xf32> -> vector<2x32xf32>
    %183 = vector.broadcast %12 : vector<1x32xf32> to vector<2x32xf32>
    %184 = arith.addf %182, %183 : vector<2x32xf32>
    %185 = math.exp %184 : vector<2x32xf32>
    %cst_58 = arith.constant dense<0.000000e+00> : vector<2xf32>
    %186 = vector.multi_reduction <add>, %185, %cst_58 [1] : vector<2x32xf32> to vector<2xf32>
    %187 = vector.shape_cast %186 : vector<2xf32> to vector<2x1xf32>
    %188 = vector.broadcast %187 : vector<2x1xf32> to vector<2x32xf32>
    %189 = arith.divf %185, %188 : vector<2x32xf32>
    %190 = vector.extract_strided_slice %189 {offsets = [0, 0], sizes = [2, 16], strides = [1, 1]} : vector<2x32xf32> to vector<2x16xf32>
    %191 = tpu.concatenate %92, %106, %120, %134, %148, %162, %176, %190 in 1 : vector<2x16xf32>, vector<2x16xf32>, vector<2x16xf32>, vector<2x16xf32>, vector<2x16xf32>, vector<2x16xf32>, vector<2x16xf32>, vector<2x16xf32> -> vector<2x128xf32>
    %c0_59 = arith.constant 0 : index
    %c0_60 = arith.constant 0 : index
    %192 = vector.load %arg5[%c0_59, %c0_60] : memref<2x128xf32, #tpu.memory_space<vmem>>, vector<2x128xf32>
    tpu.vector_store %arg5[%c0_59, %c0_60], %191 {strides = array<i32>} : memref<2x128xf32, #tpu.memory_space<vmem>>, vector<2x128xf32>,
    return
  }
}

</mosaic_0001>

<bundles_post_ra>
// kernel: _lambda_.1
= control target key start
LH: loop header
LB: loop body
LE: loop exit
PB: predicated region body
PF: predicated region fallthrough
CT: control target
= control target key end

     0   :  { %10 = vsyncpa [#allocation3], 0  ;;  %s2477_s18 = smov [#allocation2]   ;;  %s2810_s0 = inlined_call_operand.vmem [shape: s32[2,1], index: 0, kind: input, shape index: {}]   ;;  %s2811_s1 = inlined_call_operand.vmem [shape: f32[16,16], index: 1, kind: input, shape index: {}]   ;;  %s2812_s2 = inlined_call_operand.vmem [shape: f32[2,7], index: 2, kind: input, shape index: {}]   ;;  %s2813_s3 = inlined_call_operand.vmem [shape: f32[16,8], index: 3, kind: input, shape index: {}]   ;;  %s2814_s4 = inlined_call_operand.hbm [shape: f32[216,32], index: 4, kind: input, shape index: {}]   ;;  %s2815_s5 = inlined_call_operand.vmem [shape: f32[2,128], index: 5, kind: output, shape index: {}]  }
   0x1   :  { %s24_s19 = sshll.u32 %s2477_s18, 4  ;;  %s25_s19 = int_to_ptr.vmem [resolvable:$true] %s24_s19 }
   0x2   :  { %s2463_s20 = scalar_lea.vmem %s25_s19, 3456  ;;  %p2468_p1 = scmp.lt.s32.totalorder %s25_s19, %s25_s19 }
   0x3   :  { %p2464_p0 = scmp.ne.s32.totalorder %s25_s19, %s2463_s20  ;;  %p2469_p2 = scmp.lt.s32.totalorder %s2463_s20, %s2463_s20 }
   0x5   :  { %p2470_p3 = por %p2469_p2, %p2468_p1 }
   0x7   :  { %p2471_p4 = pnand %p2470_p3, %p2464_p0 }
   0x9   :  { %2474 = shalt.err (!%p2471_p4)
}
   0xa   :  { %s2478_s21 = smov 128   ;;  %s2479_s22 = smov 8  }
   0xb   :  { %30 = dma.hbm_to_vmem [thread:$0]  %s2814_s4, 3456, %s25_s19, [#allocation3], %s2478_s21, %s2478_s21, %s2479_s22  }
   0xc   :  { %2475 = dma.done.wait [#allocation3], 3456  }
   0xd   :  { %2476 = vsyncadd [#allocation3], 4294963840  ;;  %v2480_v0 = vmov 0   ;;  %vm67_vm0 = vcmask 130048   ;;  %v35_v1 = vld [vmem:[#allocation2 + $0x8] sm:$0xff]  ;;  %v34_v2 = vld [vmem:[#allocation2] sm:$0xff]  ;;  %v156_v12 = vlaneseq }
   0xe   :  { %2395 = vset.pattern.permute.xlu0 %v2480_v0  ;;  %2396 = vset.pattern.permute.xlu1 %v2480_v0  ;;  %v61_v3 = vld [vmem:[%s2811_s1] sm:$0xff]  ;;  %v62_v5 = vld [vmem:[%s2811_s1 + $0x8] sm:$0xff]  ;;  %v2481_v11 = vmov 0.0   ;;  %vm2482_vm4 = vmmov 0   ;;  %v2045_v23 = vld [vmem:[#allocation2 + $0x10] ss:$0 sm:$0xff] }
   0xf   :  { %2174 = vmatprep.subr.mxu0 %v35_v1  ;;  %2178 = vmatprep.mubr.msk.f32.mxu0 %vm67_vm0, %v61_v3  ;;  %v151_v4 = vld [vmem:[%s2810_s0] sm:$0x3]  ;;  %v157_v13 = vshrl.u32 %v156_v12, 7  ;;  %v159_v15 = vand.u32 127, %v156_v12  ;;  %v37_v31 = vld [vmem:[#allocation2 + $0x18] sm:$0x7f] }
  0x10   :  { %2175 = vmatpush3.msra.mxu0 %v35_v1  ;;  %vm152_vm1 = vcmp.gt.s32.totalorder %v151_v4, 0  ;;  %2181 = vmatprep.subr.mxu1 %v2481_v11  ;;  %vm349_vm14 = vcmask 1046528   ;;  %v340_v32 = vld [vmem:[%s2812_s2] sm:$0x3]  ;;  %vm345_vm15 = vcmask 56320   ;;  %v41_v34 = vld [vmem:[#allocation2 + $0x38] sm:$0xff] }
  0x11   :  { %2176 = vmatprep.subr.mxu0 %v34_v2  ;;  %v153_v6 = vsel %vm152_vm1, %v151_v4, 0  ;;  %2185 = vmatprep.mubr.msk.f32.mxu1 %vm2482_vm4, %v2481_v11  ;;  %v160_v14 = vmul.u32 8, %v157_v13  ;;  %v42_v33 = vld [vmem:[#allocation2 + $0x40] sm:$0xff]  ;;  %v40_v35 = vld [vmem:[#allocation2 + $0x30] sm:$0xff]  ;;  %v39_v36 = vld [vmem:[#allocation2 + $0x28] sm:$0xff]  ;;  %vm424_vm1 = vcmask 261120  }
  0x12   :  { %2177 = vmatpush3.msra.mxu0 %v34_v2  ;;  %vm154_vm2 = vcmp.lt.s32.totalorder %v153_v6, 8  ;;  %v54_v37 = vld [vmem:[#allocation2 + $0xa0] sm:$0xff]  ;;  %v45_v39 = vld [vmem:[#allocation2 + $0x58] sm:$0xff]  ;;  %v44_v40 = vld [vmem:[#allocation2 + $0x50] sm:$0xff]  ;;  %s2484_s8 = smov 64   ;;  %s2485_s9 = smov 96  }
  0x13   :  { %2179 = vmatmul.mubr.msk.f32.vlgmr.msra.gmra.mxu0 %vm67_vm0, %v62_v5  ;;  %v155_v7 = vsel %vm154_vm2, %v153_v6, 8  ;;  %2188 = vmatprep.subr.mxu0 %v2481_v11  ;;  %v162_v16 = vadd.s32 8, %v160_v14  ;;  %vm161_vm5 = vcmp.ge.s32.totalorder %v159_v15, %v160_v14  ;;  %v46_v38 = vld [vmem:[#allocation2 + $0x60] sm:$0xff]  ;;  %v43_v41 = vld [vmem:[#allocation2 + $0x48] sm:$0xff]  ;;  %vm656_vm2 = vcmask 64512   ;;  %v2579_v54 = vld [vmem:[#allocation2 + $0x98] sm:$0xff] }
  0x14   :  { %166 = vperm.xlu0 %2395, %v155_v7   ;;  %v185_v8 = vcvt.s32.f32 %v155_v7  ;;  %vm176_vm3 = vcmp.gt.s32.totalorder %v155_v7, 0  ;;  %2189 = vmatpush3.msra.mxu0 %v62_v5  ;;  %v654_v48 = vld [vmem:[%s2813_s3] sm:$0xff]  ;;  %v655_v52 = vld [vmem:[%s2813_s3 + $0x8] sm:$0xff]  ;;  %v2581_v56 = vld [vmem:[#allocation2 + $0x90] sm:$0xff]  ;;  %s2483_s3 = smov 16   ;;  %s2486_s10 = smov 32  }
  0x15   :  { %v177_v9 = vsel %vm176_vm3, 1, %v2480_v0  ;;  %2190 = vmatprep.subr.mxu0 %v2481_v11  ;;  %2192 = vmatprep.mubr.msk.f32.mxu0 %vm2482_vm4, %v2481_v11  ;;  %vm163_vm6 = vcmp.lt.s32.totalorder %v159_v15, %v162_v16  ;;  %v2053_v50 = vld [vmem:[#allocation2 + $0x20] ss:$0 sm:$0xff]  ;;  %v51_v58 = vld [vmem:[#allocation2 + $0x88] sm:$0xff]  ;;  %v49_v60 = vld [vmem:[#allocation2 + $0x78] sm:$0xff]  ;;  %vm893_vm3 = vcmask 254976  }
  0x16   :  { %v186_v10 = vmax.f32 %v185_v8, 1.0  ;;  %179 = vperm.xlu1 %2396, %v177_v9   ;;  %2191 = vmatpush3.msra.mxu0 %v61_v3  ;;  %vm164_vm7 = vmand %vm161_vm5, %vm163_vm6  ;;  %v50_v59 = vld [vmem:[#allocation2 + $0x80] sm:$0xff]  ;;  %v48_v61 = vld [vmem:[#allocation2 + $0x70] sm:$0xff]  ;;  %s2487_s11 = smov 48   ;;  %s2488_s12 = smov 80   ;;  %vm2031_vm5 = vcmask 523264  }
  0x17   :  { %2200 = vmatprep.subr.mxu0 %v2481_v11  ;;  %v2058_v4 = vld [vmem:[#allocation2 + $0x68] ss:$0 sm:$0xff]  ;;  %v2612_v12 = vld [vmem:[#allocation2 + $0xc0] sm:$0xff]  ;;  %v2616_v13 = vld [vmem:[#allocation2 + $0xb8] sm:$0xff]  ;;  %s2489_s13 = smov 112   ;;  %vm2033_vm6 = vcmask 654336  }
  0x18   :  { %262 = vperm.xlu0 %2395, %v186_v10   ;;  %v2610_v10 = vld [vmem:[#allocation2 + $0xc8] sm:$0xff] }
  0x8f   :  { %v167_v17 = vpop.permute.xlu0 %166 }
  0x90   :  { %v168_v18 = vadd.s32 %v167_v17, %v160_v14  ;;  %v2620_v14 = vld [vmem:[#allocation2 + $0xb0] sm:$0xff] }
  0x91   :  { %v180_v19 = vpop.permute.xlu1 %179 }
  0x92   :  { %vm169_vm8 = vcmp.lt.s32.totalorder %v159_v15, %v168_v18  ;;  %v2049_v20 = vadd.s32 4294967295, %v168_v18  ;;  %vm181_vm10 = vcmp.eq.s32.totalorder %v180_v19, 1 }
  0x93   :  { %vm2542_vm9 = vmand %vm164_vm7, %vm169_vm8  ;;  %v263_v44 = vpop.permute.xlu0 %262  ;;  %vm2037_vm8 = vcmask 916480  }
  0x94   :  { %vm174_vm11 = vcmp.eq.s32.totalorder %v159_v15, %v2049_v20  ;;  %v2048_v29 = vsel %vm2542_vm9, 1.0, %v2481_v11  ;;  %v2059_v15 = vld [vmem:[#allocation2 + $0xa8] ss:$0 sm:$0xff] }
  0x95   :  { %vm175_vm12 = vmand %vm164_vm7, %vm174_vm11  ;;  %vm2035_vm7 = vcmask 785408  }
  0x96   :  { %vm182_vm13 = vmand %vm175_vm12, %vm181_vm10 }
  0x97   :  { %v2050_v22 = vsel %vm182_vm13, 1.0, %v2481_v11 }
  0x98   :  { %2193 = vmatmul.mubr.msk.f32.vlgmr.msra.gmra.mxu0 %vm67_vm0, %v2050_v22  ;;  %v2637_v22 = vld [vmem:[#allocation2 + $0xd0] ss:$0 sm:$0xff] }
  0x99   :  { %2208 = vmatprep.mubr.msk.f32.mxu0 %vm2482_vm4, %v2481_v11  ;;  %2201 = vmatpush3.msra.mxu0 %v46_v38 }
  0x9a   :  { %2202 = vmatprep.subr.mxu0 %v2481_v11 }
  0x9b   :  { %2203 = vmatpush3.msra.mxu0 %v45_v39 }
  0x9c   :  { %2204 = vmatprep.subr.mxu0 %v2481_v11 }
  0x9d   :  { %2205 = vmatpush3.msra.mxu0 %v44_v40 }
  0x9e   :  { %2206 = vmatprep.subr.mxu0 %v2481_v11 }
  0x9f   :  { %2207 = vmatpush3.msra.mxu0 %v43_v41 }
  0xa0   :  { %2222 = vmatprep.subr.mxu0 %v2481_v11 }
  0xd3   :  { %v2180_v24 = vpop.f32.mrf.mxu0 }
  0xd4   :  { %v146_v25 = vadd.f32 %v2180_v24, %v2045_v23 }
  0xd5   :  { %v140_v26 = vpop.f32.mrf.mxu0 }
  0xd6   :  { %2397 = vtanh.f32 %v146_v25  ;;  %v141_v27 = vadd.f32 %v2045_v23, %v140_v26 }
  0xd8   :  { %2399 = vtanh.f32 %v141_v27 }
  0xd9   :  { %2401 = vrcp.f32 %v263_v44 }
  0xe3   :  { %v2398_v28 = vpop.eup %2397 }
  0xe4   :  { %2182 = vmatpush3.msra.mxu1 %v2398_v28 }
  0xe5   :  { %v2400_v30 = vpop.eup %2399  ;;  %2183 = vmatprep.subr.mxu1 %v2481_v11 }
  0xe6   :  { %2184 = vmatpush3.msra.mxu1 %v2400_v30  ;;  %v2402_v45 = vpop.eup %2401 }
  0xe7   :  { %2186 = vmatmul.mubr.msk.f32.vlgmr.msra.gmra.mxu1 %vm67_vm0, %v2048_v29  ;;  %2195 = vmatprep.subr.mxu1 %v2481_v11 }
  0xe8   :  { %2196 = vmatpush3.msk.msra.mxu1 %vm349_vm14, %v37_v31  ;;  %2197 = vmatprep.mubr.msk.f32.mxu1 %vm2482_vm4, %v2481_v11 }
  0xe9   :  { %2211 = vmatprep.subr.mxu1 %v2481_v11 }
  0xeb   :  { %2198 = vmatmul.mubr.msk.f32.vlgmr.msra.gmra.mxu1 %vm345_vm15, %v340_v32 }
  0xec   :  { %2212 = vmatpush3.msra.mxu1 %v42_v33  ;;  %2219 = vmatprep.mubr.msk.f32.mxu1 %vm2482_vm4, %v2481_v11 }
  0xed   :  { %2213 = vmatprep.subr.mxu1 %v2481_v11 }
  0xee   :  { %2214 = vmatpush3.msra.mxu1 %v41_v34 }
  0xef   :  { %2215 = vmatprep.subr.mxu1 %v2481_v11 }
  0xf0   :  { %2216 = vmatpush3.msra.mxu1 %v40_v35 }
  0xf1   :  { %2217 = vmatprep.subr.mxu1 %v2481_v11 }
  0xf2   :  { %2218 = vmatpush3.msra.mxu1 %v39_v36 }
  0xf3   :  { %2233 = vmatprep.subr.mxu1 %v54_v37 }
 0x158   :  { %v336_v42 = vpop.f32.mrf.mxu0 }
 0x15a   :  { %v2194_v43 = vpop.f32.mrf.mxu0 }
 0x1a7   :  { %v256_v46 = vpop.f32.mrf.mxu1 }
 0x1a8   :  { %v266_v47 = vmul.f32 %v2402_v45, %v256_v46 }
 0x1a9   :  { %v2187_v49 = vpop.f32.mrf.mxu1 }
 0x1aa   :  { %2220 = vmatmul.mubr.msk.f32.vlgmr.msra.gmra.mxu1 %vm424_vm1, %v266_v47 }
 0x1ab   :  { %v419_v51 = vpop.f32.mrf.mxu1  ;;  %2234 = vmatpush3.msra.mxu1 %v54_v37  ;;  %2235 = vmatprep.mubr.msk.f32.mxu1 %vm656_vm2, %v654_v48 }
 0x1ac   :  { %v420_v53 = vadd.f32 %v2053_v50, %v419_v51  ;;  %2238 = vmatprep.subr.mxu1 %v2481_v11 }
 0x1ad   :  { %v2199_v55 = vpop.f32.mrf.mxu1 }
 0x1ae   :  { %2403 = vtanh.f32 %v420_v53  ;;  %2236 = vmatmul.mubr.msk.f32.vlgmr.msra.gmra.mxu1 %vm656_vm2, %v655_v52 }
 0x1af   :  { %2239 = vmatpush3.msra.mxu1 %v2579_v54  ;;  %2242 = vmatprep.mubr.msk.f32.mxu1 %vm2482_vm4, %v2481_v11 }
 0x1b0   :  { %2240 = vmatprep.subr.mxu1 %v2481_v11 }
 0x1b1   :  { %2241 = vmatpush3.msra.mxu1 %v2581_v56 }
 0x1b2   :  { %2243 = vmatmul.mubr.msk.f32.vlgmr.msra.gmra.mxu1 %vm67_vm0, %v336_v42  ;;  %2256 = vmatprep.subr.mxu1 %v2481_v11 }
 0x1b3   :  { %2257 = vmatpush3.msra.mxu1 %v2579_v54  ;;  %2260 = vmatprep.mubr.msk.f32.mxu1 %vm2482_vm4, %v2481_v11 }
 0x1b4   :  { %2258 = vmatprep.subr.mxu1 %v2481_v11 }
 0x1b5   :  { %2259 = vmatpush3.msra.mxu1 %v2581_v56 }
 0x1b6   :  { %2263 = vmatprep.subr.mxu1 %v2481_v11 }
 0x1bb   :  { %v2404_v57 = vpop.eup %2403 }
 0x1bc   :  { %2209 = vmatmul.mubr.msk.f32.vlgmr.msra.gmra.mxu0 %vm424_vm1, %v2404_v57 }
 0x1bd   :  { %2230 = vmatprep.mubr.msk.f32.mxu0 %vm2482_vm4, %v2481_v11  ;;  %2223 = vmatpush3.msra.mxu0 %v51_v58 }
 0x1be   :  { %2224 = vmatprep.subr.mxu0 %v2481_v11 }
 0x1bf   :  { %2225 = vmatpush3.msra.mxu0 %v50_v59 }
 0x1c0   :  { %2226 = vmatprep.subr.mxu0 %v2481_v11 }
 0x1c1   :  { %2227 = vmatpush3.msra.mxu0 %v49_v60 }
 0x1c2   :  { %2228 = vmatprep.subr.mxu0 %v2481_v11 }
 0x1c3   :  { %2229 = vmatpush3.msra.mxu0 %v48_v61 }
 0x1c4   :  { %2245 = vmatprep.subr.mxu0 %v2481_v11 }
 0x26a   :  { %v567_v62 = vpop.f32.mrf.mxu1 }
 0x26c   :  { %v2221_v63 = vpop.f32.mrf.mxu1 }
 0x26e   :  { %v2603_v0 = vpop.f32.mrf.mxu1 }
 0x270   :  { %v2605_v1 = vpop.f32.mrf.mxu1 }
 0x271   :  { %v974_v34 = vrot.slane %v2605_v1, 2  ;;  %v1132_v49 = vrot.slane %v2605_v1, 4 }
 0x272   :  { %v807_v2 = vpop.f32.mrf.mxu1 }
 0x274   :  { %v2244_v3 = vpop.f32.mrf.mxu1 }
 0x27c   :  { %v494_v5 = vpop.f32.mrf.mxu0 }
 0x27d   :  { %v568_v6 = vadd.f32 %v567_v62, %v494_v5 }
 0x27e   :  { %v2210_v7 = vpop.f32.mrf.mxu0 }
 0x27f   :  { %v575_v8 = vadd.f32 %v2058_v4, %v568_v6  ;;  %v1290_v4 = vrot.slane %v2605_v1, 6 }
 0x281   :  { %2405 = vtanh.f32 %v575_v8 }
 0x28e   :  { %v2406_v9 = vpop.eup %2405 }
 0x28f   :  { %2231 = vmatmul.mubr.msk.f32.vlgmr.msra.gmra.mxu0 %vm424_vm1, %v2406_v9 }
 0x290   :  { %2253 = vmatprep.mubr.msk.f32.mxu0 %vm2482_vm4, %v2481_v11  ;;  %2246 = vmatpush3.msra.mxu0 %v2610_v10 }
 0x291   :  { %2247 = vmatprep.subr.mxu0 %v2481_v11 }
 0x292   :  { %2248 = vmatpush3.msra.mxu0 %v2612_v12 }
 0x293   :  { %2249 = vmatprep.subr.mxu0 %v2481_v11 }
 0x294   :  { %2250 = vmatpush3.msra.mxu0 %v2616_v13 }
 0x295   :  { %2251 = vmatprep.subr.mxu0 %v2481_v11 }
 0x296   :  { %2252 = vmatpush3.msra.mxu0 %v2620_v14 }
 0x297   :  { %2274 = vmatprep.subr.mxu0 %v2481_v11 }
 0x34f   :  { %v650_v16 = vpop.f32.mrf.mxu0 }
 0x350   :  { %v2626_v17 = vadd.f32 %v2059_v15, %v650_v16 }
 0x351   :  { %v2232_v18 = vpop.f32.mrf.mxu0 }
 0x352   :  { %v811_v19 = vadd.f32 %v807_v2, %v2626_v17 }
 0x354   :  { %v812_v20 = vadd.f32 %v811_v19, %v2605_v1 }
 0x356   :  { %2407 = vtanh.f32 %v812_v20 }
 0x363   :  { %v2408_v21 = vpop.eup %2407 }
 0x364   :  { %2254 = vmatmul.mubr.msk.f32.vlgmr.msra.gmra.mxu0 %vm424_vm1, %v2408_v21 }
 0x365   :  { %2275 = vmatpush3.msra.mxu0 %v2579_v54  ;;  %2278 = vmatprep.mubr.msk.f32.mxu0 %vm2482_vm4, %v2481_v11 }
 0x366   :  { %2276 = vmatprep.subr.mxu0 %v2481_v11 }
 0x367   :  { %2277 = vmatpush3.msra.mxu0 %v2581_v56 }
 0x368   :  { %2281 = vmatprep.subr.mxu0 %v2481_v11 }
 0x424   :  { %v887_v23 = vpop.f32.mrf.mxu0 }
 0x425   :  { %v888_v24 = vadd.f32 %v2637_v22, %v887_v23 }
 0x426   :  { %v2255_v25 = vpop.f32.mrf.mxu0 }
 0x427   :  { %v891_v26 = vmul.f32 1.442695, %v888_v24 }
 0x429   :  { %2409 = vpow2.f32 %v891_v26 }
 0x436   :  { %v2410_v27 = vpop.eup %2409 }
 0x437   :  { %v894_v28 = vsel %vm893_vm3, %v2410_v27, 0.0 }
 0x438   :  { %895 = vadd.xlane.f32.xlu1 %v894_v28 }
 0x4c1   :  { %v896_v29 = vpop.xlane.xlu1 %895 }
 0x4c2   :  { %2411 = vrcp.f32 %v896_v29 }
 0x4cf   :  { %v2412_v30 = vpop.eup %2411 }
 0x4d0   :  { %v2641_v31 = vmul.f32 %v2412_v30, %v2410_v27 }
 0x4d2   :  { %2261 = vmatmul.mubr.msk.f32.vlgmr.msra.gmra.mxu1 %vm67_vm0, %v2641_v31 }
 0x4d3   :  { %2264 = vmatpush3.msra.mxu1 %v2610_v10  ;;  %2271 = vmatprep.mubr.msk.f32.mxu1 %vm2482_vm4, %v2481_v11 }
 0x4d4   :  { %2265 = vmatprep.subr.mxu1 %v2481_v11 }
 0x4d5   :  { %2266 = vmatpush3.msra.mxu1 %v2612_v12 }
 0x4d6   :  { %2267 = vmatprep.subr.mxu1 %v2481_v11 }
 0x4d7   :  { %2268 = vmatpush3.msra.mxu1 %v2616_v13 }
 0x4d8   :  { %2269 = vmatprep.subr.mxu1 %v2481_v11 }
 0x4d9   :  { %2270 = vmatpush3.msra.mxu1 %v2620_v14 }
 0x4da   :  { %2292 = vmatprep.subr.mxu1 %v2481_v11 }
 0x592   :  { %v968_v32 = vpop.f32.mrf.mxu1 }
 0x593   :  { %v972_v33 = vadd.f32 %v968_v32, %v2626_v17 }
 0x594   :  { %v2262_v35 = vpop.f32.mrf.mxu1 }
 0x595   :  { %v976_v36 = vadd.f32 %v974_v34, %v972_v33 }
 0x597   :  { %2413 = vtanh.f32 %v976_v36 }
 0x5a4   :  { %v2414_v37 = vpop.eup %2413 }
 0x5a5   :  { %2272 = vmatmul.mubr.msk.f32.vlgmr.msra.gmra.mxu1 %vm424_vm1, %v2414_v37 }
 0x5a6   :  { %2293 = vmatpush3.msra.mxu1 %v2579_v54  ;;  %2296 = vmatprep.mubr.msk.f32.mxu1 %vm2482_vm4, %v2481_v11 }
 0x5a7   :  { %2294 = vmatprep.subr.mxu1 %v2481_v11 }
 0x5a8   :  { %2295 = vmatpush3.msra.mxu1 %v2581_v56 }
 0x5a9   :  { %2299 = vmatprep.subr.mxu1 %v2481_v11 }
 0x665   :  { %v1047_v38 = vpop.f32.mrf.mxu1 }
 0x666   :  { %v1048_v39 = vadd.f32 %v2637_v22, %v1047_v38 }
 0x667   :  { %v2273_v40 = vpop.f32.mrf.mxu1 }
 0x668   :  { %v1051_v41 = vmul.f32 1.442695, %v1048_v39  ;;  %v1605_v40 = vrot.slane %v2603_v0, 2 }
 0x66a   :  { %2415 = vpow2.f32 %v1051_v41 }
 0x677   :  { %v2416_v42 = vpop.eup %2415 }
 0x678   :  { %v1053_v43 = vsel %vm893_vm3, %v2416_v42, 0.0 }
 0x679   :  { %1054 = vadd.xlane.f32.xlu0 %v1053_v43 }
 0x702   :  { %v1055_v44 = vpop.xlane.xlu0 %1054 }
 0x703   :  { %2417 = vrcp.f32 %v1055_v44 }
 0x710   :  { %v2418_v45 = vpop.eup %2417 }
 0x711   :  { %v2666_v46 = vmul.f32 %v2418_v45, %v2416_v42 }
 0x713   :  { %2279 = vmatmul.mubr.msk.f32.vlgmr.msra.gmra.mxu0 %vm67_vm0, %v2666_v46 }
 0x714   :  { %2282 = vmatpush3.msra.mxu0 %v2610_v10  ;;  %2289 = vmatprep.mubr.msk.f32.mxu0 %vm2482_vm4, %v2481_v11 }
 0x715   :  { %2283 = vmatprep.subr.mxu0 %v2481_v11 }
 0x716   :  { %2284 = vmatpush3.msra.mxu0 %v2612_v12 }
 0x717   :  { %2285 = vmatprep.subr.mxu0 %v2481_v11 }
 0x718   :  { %2286 = vmatpush3.msra.mxu0 %v2616_v13 }
 0x719   :  { %2287 = vmatprep.subr.mxu0 %v2481_v11 }
 0x71a   :  { %2288 = vmatpush3.msra.mxu0 %v2620_v14 }
 0x71b   :  { %2310 = vmatprep.subr.mxu0 %v2481_v11 }
 0x7d3   :  { %v1127_v47 = vpop.f32.mrf.mxu0 }
 0x7d4   :  { %v1131_v48 = vadd.f32 %v1127_v47, %v2626_v17 }
 0x7d5   :  { %v2280_v50 = vpop.f32.mrf.mxu0 }
 0x7d6   :  { %v1134_v51 = vadd.f32 %v1132_v49, %v1131_v48 }
 0x7d8   :  { %2419 = vtanh.f32 %v1134_v51 }
 0x7e5   :  { %v2420_v52 = vpop.eup %2419 }
 0x7e6   :  { %2290 = vmatmul.mubr.msk.f32.vlgmr.msra.gmra.mxu0 %vm424_vm1, %v2420_v52 }
 0x7e7   :  { %2311 = vmatpush3.msra.mxu0 %v2579_v54  ;;  %2314 = vmatprep.mubr.msk.f32.mxu0 %vm2482_vm4, %v2481_v11 }
 0x7e8   :  { %2312 = vmatprep.subr.mxu0 %v2481_v11 }
 0x7e9   :  { %2313 = vmatpush3.msra.mxu0 %v2581_v56 }
 0x7ea   :  { %2317 = vmatprep.subr.mxu0 %v2481_v11 }
 0x8a6   :  { %v1205_v53 = vpop.f32.mrf.mxu0 }
 0x8a7   :  { %v1206_v55 = vadd.f32 %v2637_v22, %v1205_v53 }
 0x8a8   :  { %v2291_v57 = vpop.f32.mrf.mxu0 }
 0x8a9   :  { %v1209_v58 = vmul.f32 1.442695, %v1206_v55  ;;  %v1763_v55 = vrot.slane %v2603_v0, 4 }
 0x8ab   :  { %2421 = vpow2.f32 %v1209_v58 }
 0x8b8   :  { %v2422_v59 = vpop.eup %2421 }
 0x8b9   :  { %v1211_v60 = vsel %vm893_vm3, %v2422_v59, 0.0 }
 0x8ba   :  { %1212 = vadd.xlane.f32.xlu0 %v1211_v60 }
 0x943   :  { %v1213_v61 = vpop.xlane.xlu0 %1212 }
 0x944   :  { %2423 = vrcp.f32 %v1213_v61 }
 0x951   :  { %v2424_v62 = vpop.eup %2423 }
 0x952   :  { %v2691_v63 = vmul.f32 %v2424_v62, %v2422_v59 }
 0x954   :  { %2297 = vmatmul.mubr.msk.f32.vlgmr.msra.gmra.mxu1 %vm67_vm0, %v2691_v63 }
 0x955   :  { %2300 = vmatpush3.msra.mxu1 %v2610_v10  ;;  %2307 = vmatprep.mubr.msk.f32.mxu1 %vm2482_vm4, %v2481_v11 }
 0x956   :  { %2301 = vmatprep.subr.mxu1 %v2481_v11 }
 0x957   :  { %2302 = vmatpush3.msra.mxu1 %v2612_v12 }
 0x958   :  { %2303 = vmatprep.subr.mxu1 %v2481_v11 }
 0x959   :  { %2304 = vmatpush3.msra.mxu1 %v2616_v13 }
 0x95a   :  { %2305 = vmatprep.subr.mxu1 %v2481_v11 }
 0x95b   :  { %2306 = vmatpush3.msra.mxu1 %v2620_v14 }
 0x95c   :  { %2328 = vmatprep.subr.mxu1 %v2481_v11 }
 0xa14   :  { %v1285_v2 = vpop.f32.mrf.mxu1 }
 0xa15   :  { %v1289_v3 = vadd.f32 %v1285_v2, %v2626_v17 }
 0xa16   :  { %v2298_v5 = vpop.f32.mrf.mxu1 }
 0xa17   :  { %v1292_v6 = vadd.f32 %v1290_v4, %v1289_v3 }
 0xa19   :  { %2425 = vtanh.f32 %v1292_v6 }
 0xa26   :  { %v2426_v7 = vpop.eup %2425 }
 0xa27   :  { %2308 = vmatmul.mubr.msk.f32.vlgmr.msra.gmra.mxu1 %vm424_vm1, %v2426_v7 }
 0xa28   :  { %2329 = vmatpush3.msra.mxu1 %v2579_v54  ;;  %2332 = vmatprep.mubr.msk.f32.mxu1 %vm2482_vm4, %v2481_v11 }
 0xa29   :  { %2330 = vmatprep.subr.mxu1 %v2481_v11 }
 0xa2a   :  { %2331 = vmatpush3.msra.mxu1 %v2581_v56 }
 0xa2b   :  { %2335 = vmatprep.subr.mxu1 %v2481_v11 }
 0xae7   :  { %v1363_v8 = vpop.f32.mrf.mxu1 }
 0xae8   :  { %v1364_v1 = vadd.f32 %v2637_v22, %v1363_v8 }
 0xae9   :  { %v2309_v9 = vpop.f32.mrf.mxu1 }
 0xaea   :  { %v1367_v15 = vmul.f32 1.442695, %v1364_v1 }
 0xaec   :  { %2427 = vpow2.f32 %v1367_v15 }
 0xaf9   :  { %v2428_v16 = vpop.eup %2427 }
 0xafa   :  { %v1369_v18 = vsel %vm893_vm3, %v2428_v16, 0.0 }
 0xafb   :  { %1370 = vadd.xlane.f32.xlu1 %v1369_v18 }
 0xb84   :  { %v1371_v19 = vpop.xlane.xlu1 %1370 }
 0xb85   :  { %2429 = vrcp.f32 %v1371_v19 }
 0xb92   :  { %v2430_v20 = vpop.eup %2429 }
 0xb93   :  { %v2716_v21 = vmul.f32 %v2430_v20, %v2428_v16 }
 0xb95   :  { %2315 = vmatmul.mubr.msk.f32.vlgmr.msra.gmra.mxu0 %vm67_vm0, %v2716_v21 }
 0xb96   :  { %2318 = vmatpush3.msra.mxu0 %v2610_v10  ;;  %2325 = vmatprep.mubr.msk.f32.mxu0 %vm2482_vm4, %v2481_v11 }
 0xb97   :  { %2319 = vmatprep.subr.mxu0 %v2481_v11 }
 0xb98   :  { %2320 = vmatpush3.msra.mxu0 %v2612_v12 }
 0xb99   :  { %2321 = vmatprep.subr.mxu0 %v2481_v11 }
 0xb9a   :  { %2322 = vmatpush3.msra.mxu0 %v2616_v13 }
 0xb9b   :  { %2323 = vmatprep.subr.mxu0 %v2481_v11 }
 0xb9c   :  { %2324 = vmatpush3.msra.mxu0 %v2620_v14 }
 0xb9d   :  { %2346 = vmatprep.subr.mxu0 %v2481_v11 }
 0xc55   :  { %v1443_v23 = vpop.f32.mrf.mxu0 }
 0xc56   :  { %v1447_v24 = vadd.f32 %v1443_v23, %v2626_v17 }
 0xc57   :  { %v2316_v25 = vpop.f32.mrf.mxu0 }
 0xc58   :  { %v1448_v26 = vadd.f32 %v2603_v0, %v1447_v24 }
 0xc5a   :  { %2431 = vtanh.f32 %v1448_v26 }
 0xc67   :  { %v2432_v27 = vpop.eup %2431 }
 0xc68   :  { %2326 = vmatmul.mubr.msk.f32.vlgmr.msra.gmra.mxu0 %vm424_vm1, %v2432_v27 }
 0xc69   :  { %2347 = vmatpush3.msra.mxu0 %v2579_v54  ;;  %2350 = vmatprep.mubr.msk.f32.mxu0 %vm2482_vm4, %v2481_v11 }
 0xc6a   :  { %2348 = vmatprep.subr.mxu0 %v2481_v11 }
 0xc6b   :  { %2349 = vmatpush3.msra.mxu0 %v2581_v56 }
 0xc6c   :  { %2353 = vmatprep.subr.mxu0 %v2481_v11 }
 0xd28   :  { %v1519_v28 = vpop.f32.mrf.mxu0 }
 0xd29   :  { %v1520_v29 = vadd.f32 %v2637_v22, %v1519_v28 }
 0xd2a   :  { %v2327_v30 = vpop.f32.mrf.mxu0 }
 0xd2b   :  { %v1523_v32 = vmul.f32 1.442695, %v1520_v29 }
 0xd2d   :  { %2433 = vpow2.f32 %v1523_v32 }
 0xd3a   :  { %v2434_v33 = vpop.eup %2433 }
 0xd3b   :  { %v1525_v34 = vsel %vm893_vm3, %v2434_v33, 0.0 }
 0xd3c   :  { %1526 = vadd.xlane.f32.xlu0 %v1525_v34 }
 0xdc5   :  { %v1527_v35 = vpop.xlane.xlu0 %1526 }
 0xdc6   :  { %2435 = vrcp.f32 %v1527_v35 }
 0xdd3   :  { %v2436_v36 = vpop.eup %2435 }
 0xdd4   :  { %v2741_v37 = vmul.f32 %v2436_v36, %v2434_v33 }
 0xdd6   :  { %2333 = vmatmul.mubr.msk.f32.vlgmr.msra.gmra.mxu1 %vm67_vm0, %v2741_v37 }
 0xdd7   :  { %2336 = vmatpush3.msra.mxu1 %v2610_v10  ;;  %2343 = vmatprep.mubr.msk.f32.mxu1 %vm2482_vm4, %v2481_v11 }
 0xdd8   :  { %2337 = vmatprep.subr.mxu1 %v2481_v11 }
 0xdd9   :  { %2338 = vmatpush3.msra.mxu1 %v2612_v12 }
 0xdda   :  { %2339 = vmatprep.subr.mxu1 %v2481_v11 }
 0xddb   :  { %2340 = vmatpush3.msra.mxu1 %v2616_v13 }
 0xddc   :  { %2341 = vmatprep.subr.mxu1 %v2481_v11 }
 0xddd   :  { %2342 = vmatpush3.msra.mxu1 %v2620_v14 }
 0xdde   :  { %2364 = vmatprep.subr.mxu1 %v2481_v11 }
 0xe96   :  { %v1599_v38 = vpop.f32.mrf.mxu1 }
 0xe97   :  { %v1603_v39 = vadd.f32 %v1599_v38, %v2626_v17 }
 0xe98   :  { %v2334_v41 = vpop.f32.mrf.mxu1 }
 0xe99   :  { %v1607_v42 = vadd.f32 %v1605_v40, %v1603_v39 }
 0xe9b   :  { %2437 = vtanh.f32 %v1607_v42 }
 0xea8   :  { %v2438_v43 = vpop.eup %2437 }
 0xea9   :  { %2344 = vmatmul.mubr.msk.f32.vlgmr.msra.gmra.mxu1 %vm424_vm1, %v2438_v43 }
 0xeaa   :  { %2365 = vmatpush3.msra.mxu1 %v2579_v54  ;;  %2368 = vmatprep.mubr.msk.f32.mxu1 %vm2482_vm4, %v2481_v11 }
 0xeab   :  { %2366 = vmatprep.subr.mxu1 %v2481_v11 }
 0xeac   :  { %2367 = vmatpush3.msra.mxu1 %v2581_v56 }
 0xead   :  { %2371 = vmatprep.subr.mxu1 %v2481_v11 }
 0xf69   :  { %v1678_v44 = vpop.f32.mrf.mxu1 }
 0xf6a   :  { %v1679_v45 = vadd.f32 %v2637_v22, %v1678_v44 }
 0xf6b   :  { %v2345_v47 = vpop.f32.mrf.mxu1 }
 0xf6c   :  { %v1682_v48 = vmul.f32 1.442695, %v1679_v45 }
 0xf6e   :  { %2439 = vpow2.f32 %v1682_v48 }
 0xf7b   :  { %v2440_v49 = vpop.eup %2439 }
 0xf7c   :  { %v1684_v50 = vsel %vm893_vm3, %v2440_v49, 0.0 }
 0xf7d   :  { %1685 = vadd.xlane.f32.xlu1 %v1684_v50 }
0x1006   :  { %v1686_v54 = vpop.xlane.xlu1 %1685 }
0x1007   :  { %2441 = vrcp.f32 %v1686_v54 }
0x1014   :  { %v2442_v51 = vpop.eup %2441 }
0x1015   :  { %v2766_v52 = vmul.f32 %v2442_v51, %v2440_v49 }
0x1017   :  { %2351 = vmatmul.mubr.msk.f32.vlgmr.msra.gmra.mxu0 %vm67_vm0, %v2766_v52 }
0x1018   :  { %2354 = vmatpush3.msra.mxu0 %v2610_v10  ;;  %2361 = vmatprep.mubr.msk.f32.mxu0 %vm2482_vm4, %v2481_v11 }
0x1019   :  { %2355 = vmatprep.subr.mxu0 %v2481_v11 }
0x101a   :  { %2356 = vmatpush3.msra.mxu0 %v2612_v12 }
0x101b   :  { %2357 = vmatprep.subr.mxu0 %v2481_v11 }
0x101c   :  { %2358 = vmatpush3.msra.mxu0 %v2616_v13 }
0x101d   :  { %2359 = vmatprep.subr.mxu0 %v2481_v11 }
0x101e   :  { %2360 = vmatpush3.msra.mxu0 %v2620_v14 }
0x10d7   :  { %v1758_v56 = vpop.f32.mrf.mxu0 }
0x10d8   :  { %v1762_v53 = vadd.f32 %v1758_v56, %v2626_v17 }
0x10d9   :  { %v2352_v57 = vpop.f32.mrf.mxu0 }
0x10da   :  { %v1765_v58 = vadd.f32 %v1763_v55, %v1762_v53 }
0x10dc   :  { %2443 = vtanh.f32 %v1765_v58 }
0x10e9   :  { %v2444_v59 = vpop.eup %2443 }
0x10ea   :  { %2362 = vmatmul.mubr.msk.f32.vlgmr.msra.gmra.mxu0 %vm424_vm1, %v2444_v59 }
0x11aa   :  { %v1836_v60 = vpop.f32.mrf.mxu0 }
0x11ab   :  { %v1837_v61 = vadd.f32 %v2637_v22, %v1836_v60 }
0x11ac   :  { %v2363_v62 = vpop.f32.mrf.mxu0 }
0x11ad   :  { %v1840_v2 = vmul.f32 1.442695, %v1837_v61 }
0x11af   :  { %2445 = vpow2.f32 %v1840_v2 }
0x11bc   :  { %v2446_v3 = vpop.eup %2445 }
0x11bd   :  { %v1842_v4 = vsel %vm893_vm3, %v2446_v3, 0.0 }
0x11be   :  { %1843 = vadd.xlane.f32.xlu0 %v1842_v4 }
0x11d4   :  { %2005 = vrot.lane.b32.xlu0 %v2666_v46, %s2483_s3 }
0x11d8   :  { %2014 = vrot.lane.b32.xlu0 %v2741_v37, %s2484_s8 }
0x1247   :  { %v1844_v5 = vpop.xlane.xlu0 %1843 }
0x1248   :  { %2447 = vrcp.f32 %v1844_v5 }
0x124b   :  { %v2006_v20 = vpop.permute.xlu0 %2005 }
0x124c   :  { %v2027_v24 = vsel %vm67_vm0, %v2641_v31, %v2006_v20 }
0x124f   :  { %v2015_v26 = vpop.permute.xlu0 %2014 }
0x1255   :  { %v2448_v6 = vpop.eup %2447 }
0x1256   :  { %v1846_v7 = vmul.f32 %v2448_v6, %v2446_v3 }
0x1258   :  { %2020 = vrot.lane.b32.xlu0 %v1846_v7, %s2485_s9  ;;  %2369 = vmatmul.mubr.msk.f32.vlgmr.msra.gmra.mxu1 %vm67_vm0, %v1846_v7 }
0x1259   :  { %2372 = vmatpush3.msra.mxu1 %v2610_v10  ;;  %2379 = vmatprep.mubr.msk.f32.mxu1 %vm2482_vm4, %v2481_v11  ;;  %v1921_v10 = vrot.slane %v2603_v0, 6  ;;  %vm2029_vm4 = vcmask 392192  }
0x125a   :  { %2373 = vmatprep.subr.mxu1 %v2481_v11 }
0x125b   :  { %2374 = vmatpush3.msra.mxu1 %v2612_v12 }
0x125c   :  { %2375 = vmatprep.subr.mxu1 %v2481_v11 }
0x125d   :  { %2376 = vmatpush3.msra.mxu1 %v2616_v13 }
0x125e   :  { %2377 = vmatprep.subr.mxu1 %v2481_v11 }
0x125f   :  { %2378 = vmatpush3.msra.mxu1 %v2620_v14 }
0x12ca   :  { %v2021_v29 = vpop.permute.xlu0 %2020 }
0x1318   :  { %v1916_v46 = vpop.f32.mrf.mxu1 }
0x1319   :  { %v1920_v8 = vadd.f32 %v1916_v46, %v2626_v17 }
0x131a   :  { %v2370_v1 = vpop.f32.mrf.mxu1 }
0x131b   :  { %v1923_v9 = vadd.f32 %v1921_v10, %v1920_v8 }
0x131d   :  { %2449 = vtanh.f32 %v1923_v9 }
0x132a   :  { %v2450_v15 = vpop.eup %2449 }
0x132b   :  { %2380 = vmatmul.mubr.msk.f32.vlgmr.msra.gmra.mxu1 %vm424_vm1, %v2450_v15 }
0x13eb   :  { %v1994_v12 = vpop.f32.mrf.mxu1 }
0x13ec   :  { %v1995_v16 = vadd.f32 %v2637_v22, %v1994_v12 }
0x13ed   :  { %v2381_v18 = vpop.f32.mrf.mxu1 }
0x13ee   :  { %v1998_v13 = vmul.f32 1.442695, %v1995_v16 }
0x13f0   :  { %2451 = vpow2.f32 %v1998_v13 }
0x13fd   :  { %v2452_v11 = vpop.eup %2451 }
0x13fe   :  { %v2000_v14 = vsel %vm893_vm3, %v2452_v11, 0.0 }
0x13ff   :  { %2001 = vadd.xlane.f32.xlu1 %v2000_v14 }
0x1410   :  { %2008 = vrot.lane.b32.xlu1 %v2691_v63, %s2486_s10 }
0x1414   :  { %2011 = vrot.lane.b32.xlu1 %v2716_v21, %s2487_s11 }
0x1418   :  { %2017 = vrot.lane.b32.xlu1 %v2766_v52, %s2488_s12 }
0x1488   :  { %v2002_v0 = vpop.xlane.xlu1 %2001 }
0x1489   :  { %2453 = vrcp.f32 %v2002_v0 }
0x148c   :  { %v2009_v19 = vpop.permute.xlu1 %2008 }
0x148d   :  { %v2028_v63 = vsel %vm424_vm1, %v2027_v24, %v2009_v19 }
0x1490   :  { %v2012_v23 = vpop.permute.xlu1 %2011 }
0x1491   :  { %v2030_v25 = vsel %vm2029_vm4, %v2028_v63, %v2012_v23 }
0x1492   :  { %v2032_v27 = vsel %vm2031_vm5, %v2030_v25, %v2015_v26 }
0x1494   :  { %v2018_v21 = vpop.permute.xlu1 %2017 }
0x1495   :  { %v2034_v28 = vsel %vm2033_vm6, %v2032_v27, %v2018_v21 }
0x1496   :  { %v2454_v17 = vpop.eup %2453  ;;  %v2036_v30 = vsel %vm2035_vm7, %v2034_v28, %v2021_v29 }
0x1497   :  { %v2004_v22 = vmul.f32 %v2454_v17, %v2452_v11 }
0x1499   :  { %2024 = vrot.lane.b32.xlu1 %v2004_v22, %s2489_s13 }
0x150b   :  { %v2025_v32 = vpop.permute.xlu1 %2024 }
0x150c   :  { %v2038_v33 = vsel %vm2037_vm8, %v2036_v30, %v2025_v32 }
0x150d   :  { %2039 = vst [vmem:[%s2815_s5] sm:$0x3] %v2038_v33 }
0x150e   :  { %2044 = vsyncpa [#allocation3], 1 }

</bundles_post_ra>
